<compile_context>
chip_gen: v7x
topology: tpu7x:2x2x1
jax: 0.10.0
libtpu: 0.0.40
codegen_flags: <defaults>
</compile_context>

<pallas_src>
import functools

import jax
import jax.numpy as jnp
from jax.experimental import pallas as pl
from jax.experimental.pallas import tpu as pltpu

_NEG_INF = -1e30
_VMEM_LIMIT = 48 * 1024 * 1024  # above default scoped VMEM, below v7x physical


def _grid_compiler_params():
    return pltpu.CompilerParams(
        dimension_semantics=("parallel",),       # megacore split on v7x
        vmem_limit_bytes=_VMEM_LIMIT)


def _attention_head(a_dst_col, a_src_row, mask, xp_head):
    """One GAT attention head for a [tm, N] tile of destination rows.

    a_dst_col: [tm, 1]  destination logits for this head
    a_src_row: [1, N]   source logits for this head
    mask:      [tm, N]  bool edge mask (j -> i)
    xp_head:   [N, ch]  projected source features (bf16)
    returns    [tm, ch] f32, softmax-normalized aggregation
    """
    e = a_dst_col + a_src_row                         # [tm, N]
    e = jnp.where(e > 0, e, 0.2 * e)                  # LeakyReLU(0.2)
    e = jnp.where(mask, e, _NEG_INF)                  # mask non-edges
    e = e - jnp.max(e, axis=-1, keepdims=True)
    p = jnp.exp(e)                                    # non-edges underflow to 0
    denom = jnp.sum(p, axis=-1, keepdims=True)        # >= exp(0) via self-loop
    agg = jnp.dot(p.astype(jnp.bfloat16), xp_head,
                  preferred_element_type=jnp.float32)  # bf16 MXU, f32 acc
    # Deferred normalization: divide the [tm, ch] result, not [tm, N] probs.
    return agg * pl.reciprocal(denom, approx=True)


def proj_kernel(x_ref, w_ref, attm_ref, xp_ref, lg_ref):
    """Row-tiled projection + attention logits: xp = x @ W, lg = xp @ att_mat."""
    xp = jnp.dot(x_ref[...].astype(jnp.bfloat16), w_ref[...],
                 preferred_element_type=jnp.float32)             # [tm, H*ch]
    xp_ref[...] = xp.astype(jnp.bfloat16)
    lg_ref[...] = jnp.dot(xp, attm_ref[...],
                          preferred_element_type=jnp.float32)    # [tm, 2*H]


def attn1_kernel(adj_ref, xp_ref, lg_ref, b_ref, s_ref, t_ref,
                 w2_ref, attm2_ref, xp2_ref, lg2_ref, h1_acc,
                 *, heads, ch, tm):
    """Layer-1 attention (concat heads) + BN1 + ReLU for one dst-row tile,
    fused with the layer-2 projection / logits for the same rows."""
    row0 = pl.multiple_of(pl.program_id(0) * tm, tm)
    mask = adj_ref[...] > 0                            # [tm, N]
    lg_all = lg_ref[...]                               # [N, 2*heads] (f32)
    a_src_t = lg_all[:, :heads].T                      # [heads, N]
    a_dst = lg_ref[pl.ds(row0, tm), :][:, heads:]      # [tm, heads]
    xp_all = xp_ref[...]                               # [N, heads*ch] (bf16)

    for h in range(heads):                             # small, static unroll
        h1_acc[:, h * ch:(h + 1) * ch] = _attention_head(
            a_dst[:, h:h + 1], a_src_t[h:h + 1, :], mask,
            xp_all[:, h * ch:(h + 1) * ch])

    h1 = h1_acc[...] + b_ref[...]                          # GATConv bias
    h1 = jnp.maximum(h1 * s_ref[...] + t_ref[...], 0.0)    # BN1 (folded) + ReLU

    # Fused layer-2 projection + logits for this tile's rows.
    xp2 = jnp.dot(h1.astype(jnp.bfloat16), w2_ref[...],
                  preferred_element_type=jnp.float32)
    xp2_ref[...] = xp2.astype(jnp.bfloat16)
    lg2_ref[...] = jnp.dot(xp2, attm2_ref[...],
                           preferred_element_type=jnp.float32)


def attn2_kernel(adj_ref, xp_ref, lg_ref, b_ref, s_ref, t_ref, out_ref,
                 *, heads, ch, tm):
    """Layer-2 attention (mean over heads) + BN2 + ReLU for one dst-row tile."""
    row0 = pl.multiple_of(pl.program_id(0) * tm, tm)
    mask = adj_ref[...] > 0
    lg_all = lg_ref[...]
    a_src_t = lg_all[:, :heads].T
    a_dst = lg_ref[pl.ds(row0, tm), :][:, heads:]
    xp_all = xp_ref[...]

    acc = jnp.zeros((tm, ch), jnp.float32)
    for h in range(heads):
        acc = acc + _attention_head(
            a_dst[:, h:h + 1], a_src_t[h:h + 1, :], mask,
            xp_all[:, h * ch:(h + 1) * ch])

    out = acc * (1.0 / heads) + b_ref[...]             # mean over heads + bias
    out_ref[...] = jnp.maximum(out * s_ref[...] + t_ref[...], 0.0)  # BN2 + ReLU


def head_kernel(pool_ref, h2_ref, wp1_ref, sp_ref, tp_ref, wp2_ref, bp2_ref,
                out_ref):
    """global_add_pool + MLP([ch, ch, 1], bias=[False, True]) head."""
    pooled = jnp.dot(pool_ref[...], h2_ref[...],
                     preferred_element_type=jnp.float32)          # [G, ch]
    z = jnp.dot(pooled, wp1_ref[...], preferred_element_type=jnp.float32)
    z = jnp.maximum(z * sp_ref[...] + tp_ref[...], 0.0)           # BN + ReLU
    out_ref[...] = jnp.dot(z, wp2_ref[...],
                           preferred_element_type=jnp.float32) + bp2_ref[...]


def _block_diag_att(att_src, att_dst):
    """[H, ch] x 2 -> [H*ch, 2*H] so one matmul produces all per-head logits.
    Columns 0..H-1 are a_src per head, H..2H-1 are a_dst per head."""
    H, ch = att_src.shape
    m = jnp.zeros((H * ch, 2 * H), dtype=jnp.float32)
    for h in range(H):
        m = m.at[h * ch:(h + 1) * ch, h].set(att_src[h])
        m = m.at[h * ch:(h + 1) * ch, H + h].set(att_dst[h])
    return m


def gatnet_forward(x, adj, pool, params, *, heads, hidden):
    N, fin = x.shape
    num_graphs = pool.shape[0]
    hc = heads * hidden
    tm = 128 if N % 128 == 0 else N                 # destination-row tile
    grid = (N // tm,)

    adj_bf16 = adj.astype(jnp.bfloat16)             # halve adj footprint
    w1 = params["w1"].astype(jnp.bfloat16)
    w2 = params["w2"].astype(jnp.bfloat16)
    attm1 = _block_diag_att(params["att_src1"], params["att_dst1"])
    attm2 = _block_diag_att(params["att_src2"], params["att_dst2"])

    cp = _grid_compiler_params()

    # 1) layer-1 projection + all per-head attention logits (row-tiled).
    xp1, lg1 = pl.pallas_call(
        proj_kernel,
        grid=grid,
        in_specs=[pl.BlockSpec((tm, fin), lambda i: (i, 0)),
                  pl.BlockSpec((fin, hc), lambda i: (0, 0)),
                  pl.BlockSpec((hc, 2 * heads), lambda i: (0, 0))],
        out_specs=[pl.BlockSpec((tm, hc), lambda i: (i, 0)),
                   pl.BlockSpec((tm, 2 * heads), lambda i: (i, 0))],
        out_shape=[jax.ShapeDtypeStruct((N, hc), jnp.bfloat16),
                   jax.ShapeDtypeStruct((N, 2 * heads), jnp.float32)],
        compiler_params=cp,
    )(x, w1, attm1)

    # 2) layer-1 attention + BN1 + ReLU, fused with layer-2 projection/logits.
    xp2, lg2 = pl.pallas_call(
        functools.partial(attn1_kernel, heads=heads, ch=hidden, tm=tm),
        grid=grid,
        in_specs=[pl.BlockSpec((tm, N), lambda i: (i, 0)),         # adj tile
                  pl.BlockSpec((N, hc), lambda i: (0, 0)),         # xp1 resident
                  pl.BlockSpec((N, 2 * heads), lambda i: (0, 0)),  # lg1 resident
                  pl.BlockSpec((1, hc), lambda i: (0, 0)),         # bias1
                  pl.BlockSpec((1, hc), lambda i: (0, 0)),         # bn1 scale
                  pl.BlockSpec((1, hc), lambda i: (0, 0)),         # bn1 shift
                  pl.BlockSpec((hc, hc), lambda i: (0, 0)),        # w2
                  pl.BlockSpec((hc, 2 * heads), lambda i: (0, 0))],
        out_specs=[pl.BlockSpec((tm, hc), lambda i: (i, 0)),
                   pl.BlockSpec((tm, 2 * heads), lambda i: (i, 0))],
        out_shape=[jax.ShapeDtypeStruct((N, hc), jnp.bfloat16),
                   jax.ShapeDtypeStruct((N, 2 * heads), jnp.float32)],
        scratch_shapes=[pltpu.VMEM((tm, hc), jnp.float32)],  # lane-dense slab
        compiler_params=cp,
    )(adj_bf16, xp1, lg1, params["b1"], params["bn1_scale"],
      params["bn1_shift"], w2, attm2)

    # 3) layer-2 attention (mean over heads) + BN2 + ReLU.
    h2 = pl.pallas_call(
        functools.partial(attn2_kernel, heads=heads, ch=hidden, tm=tm),
        grid=grid,
        in_specs=[pl.BlockSpec((tm, N), lambda i: (i, 0)),
                  pl.BlockSpec((N, hc), lambda i: (0, 0)),
                  pl.BlockSpec((N, 2 * heads), lambda i: (0, 0)),
                  pl.BlockSpec((1, hidden), lambda i: (0, 0)),
                  pl.BlockSpec((1, hidden), lambda i: (0, 0)),
                  pl.BlockSpec((1, hidden), lambda i: (0, 0))],
        out_specs=pl.BlockSpec((tm, hidden), lambda i: (i, 0)),
        out_shape=jax.ShapeDtypeStruct((N, hidden), jnp.float32),
        compiler_params=cp,
    )(adj_bf16, xp2, lg2, params["b2"], params["bn2_scale"],
      params["bn2_shift"])

    # 4) pooling + predictor MLP (tiny, single ungridded call).
    vmem = pl.BlockSpec(memory_space=pltpu.MemorySpace.VMEM)
    out = pl.pallas_call(
        head_kernel,
        out_shape=jax.ShapeDtypeStruct((num_graphs, 1), jnp.float32),
        in_specs=[vmem] * 7,
        out_specs=vmem,
        compiler_params=pltpu.CompilerParams(vmem_limit_bytes=_VMEM_LIMIT),
    )(pool, h2, params["wp1"], params["bnp_scale"], params["bnp_shift"],
      params["wp2"], params["bp2"])
    return out


def init_params(key, node_features, hidden, heads, output_dim):
    ks = jax.random.split(key, 16)

    def rnd(k, shape, scale=0.1):
        return (scale * jax.random.normal(k, shape)).astype(jnp.float32)

    def bn_fold(k, dim):
        # eval-mode BatchNorm: running_mean=0, running_var=1, random gamma/beta.
        kg, kb = jax.random.split(k)
        gamma = 1.0 + 0.1 * jax.random.normal(kg, (1, dim))
        beta = 0.1 * jax.random.normal(kb, (1, dim))
        eps = 1e-5
        scale = (gamma / jnp.sqrt(1.0 + eps)).astype(jnp.float32)
        shift = beta.astype(jnp.float32)
        return scale, shift

    p = {}
    # conv1: in=node_features, out=hidden, heads, concat=True
    p["w1"] = rnd(ks[0], (node_features, heads * hidden))
    p["att_src1"] = rnd(ks[1], (heads, hidden))
    p["att_dst1"] = rnd(ks[2], (heads, hidden))
    p["b1"] = rnd(ks[3], (1, heads * hidden))
    p["bn1_scale"], p["bn1_shift"] = bn_fold(ks[4], heads * hidden)
    # conv2: in=heads*hidden, out=hidden, heads, concat=False
    p["w2"] = rnd(ks[5], (heads * hidden, heads * hidden))
    p["att_src2"] = rnd(ks[6], (heads, hidden))
    p["att_dst2"] = rnd(ks[7], (heads, hidden))
    p["b2"] = rnd(ks[8], (1, hidden))
    p["bn2_scale"], p["bn2_shift"] = bn_fold(ks[9], hidden)
    # predictor MLP([hidden, hidden, output_dim], bias=[False, True])
    p["wp1"] = rnd(ks[10], (hidden, hidden))
    p["bnp_scale"], p["bnp_shift"] = bn_fold(ks[11], hidden)
    p["wp2"] = rnd(ks[12], (hidden, output_dim))
    p["bp2"] = rnd(ks[13], (1, output_dim))
    return p


if __name__ == "__main__":
    key = jax.random.PRNGKey(0)
    k_x, k_p = jax.random.split(key)

    node_features, hidden, heads, output_dim = 4, 64, 4, 1
    nodes_per_graph, num_graphs = 128, 2          # N = 256 -> 2 row tiles of 128
    N = nodes_per_graph * num_graphs

    # Node features.
    x = jax.random.normal(k_x, (N, node_features), dtype=jnp.float32)

    # Deterministic edge_index: bidirectional ring inside each graph.
    src_list, dst_list = [], []
    for g in range(num_graphs):
        off = g * nodes_per_graph
        for i in range(nodes_per_graph):
            a, b = off + i, off + (i + 1) % nodes_per_graph
            src_list += [a, b]
            dst_list += [b, a]
    src = jnp.array(src_list, dtype=jnp.int32)
    dst = jnp.array(dst_list, dtype=jnp.int32)

    # Dense adjacency mask adj[i, j] = 1 iff edge j -> i, plus self-loops.
    adj = jnp.zeros((N, N), dtype=jnp.float32).at[dst, src].set(1.0)
    adj = jnp.maximum(adj, jnp.eye(N, dtype=jnp.float32))

    # Pooling matrix for global_add_pool (batch vector -> one-hot rows).
    batch = jnp.repeat(jnp.arange(num_graphs, dtype=jnp.int32), nodes_per_graph)
    pool = jnp.zeros((num_graphs, N), dtype=jnp.float32).at[
        batch, jnp.arange(N)].set(1.0)

    params = init_params(k_p, node_features, hidden, heads, output_dim)

    out = gatnet_forward(x, adj, pool, params, heads=heads, hidden=hidden)
    out = jax.block_until_ready(out)
    assert out.shape == (num_graphs, output_dim) and out.dtype == jnp.float32
    print("KERNEL_OK")
</pallas_src>

<mosaic_0001>
module attributes {stable_mosaic.version = 11 : i64} {
  func.func @proj_kernel(%arg0: i32, %arg1: memref<128x4xf32, #tpu.memory_space<vmem>>, %arg2: memref<4x256xbf16, #tpu.memory_space<vmem>>, %arg3: memref<256x8xf32, #tpu.memory_space<vmem>>, %arg4: memref<128x256xbf16, #tpu.memory_space<vmem>>, %arg5: memref<128x8xf32, #tpu.memory_space<vmem>>) attributes {dimension_semantics = [#tpu.dimension_semantics<parallel>], iteration_bounds = array<i64: 2>, scalar_prefetch = 0 : i64, scratch_operands = 0 : i64, tpu.core_type = #tpu.core_type<tc>, window_params = [{transform_indices = @transform_0, window_bounds = array<i64: 128, 4>}, {pipeline_mode = #tpu.pipeline_mode<synchronous>, transform_indices = @transform_1, window_bounds = array<i64: 4, 256>}, {pipeline_mode = #tpu.pipeline_mode<synchronous>, transform_indices = @transform_2, window_bounds = array<i64: 256, 8>}, {transform_indices = @transform_3, window_bounds = array<i64: 128, 256>}, {transform_indices = @transform_4, window_bounds = array<i64: 128, 8>}]} {
    %c0 = arith.constant 0 : index
    %c0_0 = arith.constant 0 : index
    %0 = vector.load %arg1[%c0, %c0_0] : memref<128x4xf32, #tpu.memory_space<vmem>>, vector<128x4xf32>
    %1 = arith.truncf %0 : vector<128x4xf32> to vector<128x4xbf16>
    %c0_1 = arith.constant 0 : index
    %c0_2 = arith.constant 0 : index
    %2 = vector.load %arg2[%c0_1, %c0_2] : memref<4x256xbf16, #tpu.memory_space<vmem>>, vector<4x256xbf16>
    %cst = arith.constant dense<0.000000e+00> : vector<128x256xf32>
    %3 = tpu.matmul %1, %2, %cst {dimension_numbers = #tpu.dot_dimension_numbers<[1], [0], [0], [1], [0, 0, 1, 1], [], []>} : vector<128x4xbf16>, vector<4x256xbf16>, vector<128x256xf32> -> vector<128x256xf32>
    %4 = arith.truncf %3 : vector<128x256xf32> to vector<128x256xbf16>
    %c0_3 = arith.constant 0 : index
    %c0_4 = arith.constant 0 : index
    %5 = vector.load %arg4[%c0_3, %c0_4] : memref<128x256xbf16, #tpu.memory_space<vmem>>, vector<128x256xbf16>
    tpu.vector_store %arg4[%c0_3, %c0_4], %4 {strides = array<i32>} : memref<128x256xbf16, #tpu.memory_space<vmem>>, vector<128x256xbf16>,
    %c0_5 = arith.constant 0 : index
    %c0_6 = arith.constant 0 : index
    %6 = vector.load %arg3[%c0_5, %c0_6] : memref<256x8xf32, #tpu.memory_space<vmem>>, vector<256x8xf32>
    %cst_7 = arith.constant dense<0.000000e+00> : vector<128x8xf32>
    %7 = tpu.matmul %3, %6, %cst_7 {dimension_numbers = #tpu.dot_dimension_numbers<[1], [0], [0], [1], [0, 0, 1, 1], [], []>} : vector<128x256xf32>, vector<256x8xf32>, vector<128x8xf32> -> vector<128x8xf32>
    %c0_8 = arith.constant 0 : index
    %c0_9 = arith.constant 0 : index
    %8 = vector.load %arg5[%c0_8, %c0_9] : memref<128x8xf32, #tpu.memory_space<vmem>>, vector<128x8xf32>
    tpu.vector_store %arg5[%c0_8, %c0_9], %7 {strides = array<i32>} : memref<128x8xf32, #tpu.memory_space<vmem>>, vector<128x8xf32>,
    return
  }
  func.func @transform_0(%arg0: i32) -> (i32, i32) {
    %c0_i32 = arith.constant 0 : i32
    %c0_i32_0 = arith.constant 0 : i32
    return %arg0, %c0_i32 : i32, i32
  }
  func.func @transform_1(%arg0: i32) -> (i32, i32) {
    %c0_i32 = arith.constant 0 : i32
    %c0_i32_0 = arith.constant 0 : i32
    %c0_i32_1 = arith.constant 0 : i32
    return %c0_i32, %c0_i32_0 : i32, i32
  }
  func.func @transform_2(%arg0: i32) -> (i32, i32) {
    %c0_i32 = arith.constant 0 : i32
    %c0_i32_0 = arith.constant 0 : i32
    %c0_i32_1 = arith.constant 0 : i32
    return %c0_i32, %c0_i32_0 : i32, i32
  }
  func.func @transform_3(%arg0: i32) -> (i32, i32) {
    %c0_i32 = arith.constant 0 : i32
    %c0_i32_0 = arith.constant 0 : i32
    return %arg0, %c0_i32 : i32, i32
  }
  func.func @transform_4(%arg0: i32) -> (i32, i32) {
    %c0_i32 = arith.constant 0 : i32
    %c0_i32_0 = arith.constant 0 : i32
    return %arg0, %c0_i32 : i32, i32
  }
}

</mosaic_0001>

<bundles_post_ra>
// kernel: tpu_custom_call.1
= control target key start
LH: loop header
LB: loop body
LE: loop exit
PB: predicated region body
PF: predicated region fallthrough
CT: control target
= control target key end

     0   :  { %10 = vsyncpa [#allocation3], 0  ;;  %s1434_s0 = inlined_call_operand.vmem [shape: f32[256,4], index: 0, kind: input, shape index: {}]   ;;  %s1435_s1 = inlined_call_operand.vmem [shape: bf16[4,256], index: 1, kind: input, shape index: {}]   ;;  %s1436_s2 = inlined_call_operand.vmem [shape: f32[256,8], index: 2, kind: input, shape index: {}]   ;;  %s1437_s3 = inlined_call_operand.hbm [shape: bf16[256,256], index: 3, kind: output, shape index: {0}]   ;;  %s1438_s4 = inlined_call_operand.vmem [shape: f32[256,8], index: 4, kind: output, shape index: {1}]  }
   0x1   :  { %12 = vsyncpa [#allocation3 + $0x1], 0  ;;  %s1132_s15 = smov 0   ;;  %s1134_s16 = smov 0  }
   0x2   :  { %s1136_s17 = smov 0   ;;  %s1138_s18 = smov 0  }
   0x3 LB: > { %s1153_s19 = sadd.s32 4294967295, %s1101_s18   ;;  %s810_s20 = sadd.s32 4294967294, %s1101_s18   ;;  %s1101_s18 = sphi %s1138_s18, %s1444_s18   ;;  %s1097_s17 = sphi %s1136_s17, %s1443_s17   ;;  %s1093_s16 = sphi %s1134_s16, %s1442_s16   ;;  %s1089_s15 = sphi %s1132_s15, %s1441_s15  }
   0x4   : > { %s1157_s21 = sadd.s32 1, %s1101_s18   ;;  %s93_s22 = sadd.s32 1, %s1097_s17 }
   0x5   : > { %s90_s23 = ssub.s32 %s1101_s18, %s1157_s21  ;;  %p103_p0 = scmp.ne.s32.totalorder %s1097_s17, %s1093_s16 }
   0x6   : > { %p91_p1 = scmp.eq.s32.totalorder %s90_s23, 0  ;;  %p104_p2 = scmp.eq.s32.totalorder %s1153_s19, 1 }
   0x7   : > { %p109_p3 = scmp.ne.s32.totalorder %s1093_s16, %s1089_s15  ;;  %p110_p4 = scmp.eq.s32.totalorder %s810_s20, 1 }
   0x8   : > { %s1168_s24 = scalar_select %p91_p1, %s1097_s17, %s93_s22  }
   0x9   : > { %p1170_p5 = por %p104_p2, %p103_p0  ;;  %p1174_p6 = por %p110_p4, %p109_p3 }
   0xa   : > { %p813_p7 = scmp.ge.s32.totalorder %s1101_s18, 1  ;;  %p169_p8 = scmp.lt.s32.totalorder %s1101_s18, 3 }
   0xc   : > { %p170_p9 = pnand %p813_p7, %p169_p8 }
   0xd   : > { %v819_v0 = vld.sshfl [vmem:[%s1435_s1] sm:$0x33 pattern:$0x76325410] (!%p170_p9)  ;;  %vm273_vm0 = vcmask (!%p170_p9), 1041408   ;;  %v1103_v3 = vmov (!%p170_p9), 0  }
   0xe   : > { %173 = sbr.rel (%p170_p9) target bundleno = 517 (0x205), region = 32  ;;  %v247_v1 = vcombine.high (!%p170_p9), %v819_v0, %v819_v0  ;;  %v275_v2 = vsel (!%p170_p9), %vm273_vm0, %v819_v0, 0  ;;  %312 = vmatprep.mubr.bf16.mxu0 (!%p170_p9), %v1103_v3  ;;  %s815_s29 = sshll.u32 (!%p170_p9), %s1153_s19, 4  ;;  %v521_v4 = vld [vmem:[%s1436_s2 + $0x80] sm:$0xff] (!%p170_p9)  ;;  %v522_v5 = vld [vmem:[%s1436_s2 + $0x88] sm:$0xff] (!%p170_p9)  ;;  %v523_v9 = vld [vmem:[%s1436_s2 + $0x90] sm:$0xff] (!%p170_p9) }
   0xf   : > { %v505_v6 = vld [vmem:[%s1436_s2] sm:$0xff] (!%p170_p9)  ;;  %p201_p10 = scmp.lt.s32.totalorder (!%p170_p9), %s815_s29, 31  ;;  %v949_v7 = vpack.c.bf16 (!%p170_p9), %v522_v5, %v521_v4  ;;  %v506_v8 = vld [vmem:[%s1436_s2 + $0x8] sm:$0xff] (!%p170_p9)  ;;  %v524_v10 = vld [vmem:[%s1436_s2 + $0x98] sm:$0xff] (!%p170_p9)  ;;  %vm248_vm1 = vcmask (!%p170_p9), 31744   ;;  %s190_s14 = sand.u32 (!%p170_p9), 1, %s1093_s16  }
  0x10   : > { %820 = vmatprep.subr.msk.bf16.mxu0 (!%p170_p9), %vm273_vm0, %v247_v1  ;;  %v951_v11 = vpack.c.bf16 (!%p170_p9), %v506_v8, %v505_v6  ;;  %v953_v12 = vpack.c.bf16 (!%p170_p9), %v524_v10, %v523_v9  ;;  %v507_v13 = vld [vmem:[%s1436_s2 + $0x10] sm:$0xff] (!%p170_p9)  ;;  %v508_v14 = vld [vmem:[%s1436_s2 + $0x18] sm:$0xff] (!%p170_p9)  ;;  %v525_v15 = vld [vmem:[%s1436_s2 + $0xa0] sm:$0xff] (!%p170_p9)  ;;  %s814_s20 = sshll.u32 (!%p170_p9), %s190_s14, 7  ;;  %s868_s22 = sshll.u32 (!%p170_p9), %s1153_s19, 11 }
  0x11   : > { %281 = vmatpush1.bf16.msra.mxu0 (!%p170_p9), %v275_v2  ;;  %981 = vmatprep.subr.bf16.mxu1 (!%p170_p9), %v949_v7  ;;  %v526_v16 = vld [vmem:[%s1436_s2 + $0xa8] sm:$0xff] (!%p170_p9)  ;;  %v955_v17 = vpack.c.bf16 (!%p170_p9), %v508_v14, %v507_v13  ;;  %v509_v18 = vld [vmem:[%s1436_s2 + $0x20] sm:$0xff] (!%p170_p9)  ;;  %v527_v24 = vld [vmem:[%s1436_s2 + $0xb0] sm:$0xff] (!%p170_p9)  ;;  %s1348_s30 = scalar_lea.hbm (!%p170_p9), %s1437_s3, %s868_s22  ;;  %s1354_s5 = scalar_lea.sflag (!%p170_p9), [#allocation3], %s190_s14 }
  0x12   : > { %950 = vmatprep.subr.bf16.mxu0 (!%p170_p9), %v949_v7  ;;  %989 = vmatpush3.bf16.msra.mxu1 (!%p170_p9), %v951_v11  ;;  %v957_v21 = vpack.c.bf16 (!%p170_p9), %v526_v16, %v525_v15  ;;  %v510_v22 = vld [vmem:[%s1436_s2 + $0x28] sm:$0xff] (!%p170_p9)  ;;  %v528_v25 = vld [vmem:[%s1436_s2 + $0xb8] sm:$0xff] (!%p170_p9)  ;;  %v511_v27 = vld [vmem:[%s1436_s2 + $0x30] sm:$0xff] (!%p170_p9)  ;;  %s1104_s19 = smov (!%p170_p9), [#allocation2]  }
  0x13   : > { %982 = vmatprep.subr.bf16.mxu1 (!%p170_p9), %v953_v12  ;;  %v959_v26 = vpack.c.bf16 (!%p170_p9), %v510_v22, %v509_v18  ;;  %v961_v30 = vpack.c.bf16 (!%p170_p9), %v528_v25, %v527_v24  ;;  %v512_v31 = vld [vmem:[%s1436_s2 + $0x38] sm:$0xff] (!%p170_p9)  ;;  %v529_v32 = vld [vmem:[%s1436_s2 + $0xc0] sm:$0xff] (!%p170_p9)  ;;  %v530_v33 = vld [vmem:[%s1436_s2 + $0xc8] sm:$0xff] (!%p170_p9)  ;;  %s1043_s7 = sshll.u32 (!%p170_p9), %s1104_s19, 4  ;;  %s1044_s7 = int_to_ptr.vmem [resolvable:$false] %s1043_s7 }
  0x14   : > { %v963_v35 = vpack.c.bf16 (!%p170_p9), %v512_v31, %v511_v27  ;;  %v965_v36 = vpack.c.bf16 (!%p170_p9), %v530_v33, %v529_v32  ;;  %v513_v37 = vld [vmem:[%s1436_s2 + $0x40] sm:$0xff] (!%p170_p9)  ;;  %v514_v38 = vld [vmem:[%s1436_s2 + $0x48] sm:$0xff] (!%p170_p9)  ;;  %v531_v39 = vld [vmem:[%s1436_s2 + $0xd0] sm:$0xff] (!%p170_p9)  ;;  %s1045_s9 = scalar_lea.vmem (!%p170_p9), %s1044_s7, 4096 }
  0x15   : > { %s1446_s29 = smov (!%p201_p10, %s815_s29), 31  ;;  %v532_v40 = vld [vmem:[%s1436_s2 + $0xd8] sm:$0xff]  ;;  %v967_v42 = vpack.c.bf16 %v514_v38, %v513_v37  ;;  %v515_v45 = vld [vmem:[%s1436_s2 + $0x50] sm:$0xff]  ;;  %v533_v47 = vld [vmem:[%s1436_s2 + $0xe0] sm:$0xff] }
  0x16   : > { %s816_s8 = sshll.u32 %s1446_s29, 3  ;;  %990 = vmatpush3.bf16.msra.mxu1 %v955_v17  ;;  %v969_v44 = vpack.c.bf16 %v532_v40, %v531_v39  ;;  %v516_v46 = vld [vmem:[%s1436_s2 + $0x58] sm:$0xff]  ;;  %v534_v48 = vld [vmem:[%s1436_s2 + $0xe8] sm:$0xff]  ;;  %v517_v52 = vld [vmem:[%s1436_s2 + $0x60] sm:$0xff] }
  0x17   : > { %s1223_s11 = scalar_lea.vmem %s1434_s0, %s816_s8  ;;  %983 = vmatprep.subr.bf16.mxu1 %v957_v21  ;;  %v971_v50 = vpack.c.bf16 %v516_v46, %v515_v45  ;;  %v973_v51 = vpack.c.bf16 %v534_v48, %v533_v47  ;;  %v518_v53 = vld [vmem:[%s1436_s2 + $0x68] sm:$0xff]  ;;  %v535_v54 = vld [vmem:[%s1436_s2 + $0xf0] sm:$0xff]  ;;  %v536_v55 = vld [vmem:[%s1436_s2 + $0xf8] sm:$0xff] }
  0x18   : > { %v214_v19 = vld [vmem:[%s1223_s11] sm:$0xff]  ;;  %v215_v20 = vld [vmem:[%s1223_s11 + $0x8] sm:$0xff]  ;;  %v216_v28 = vld [vmem:[%s1223_s11 + $0x10] sm:$0xff]  ;;  %v975_v56 = vpack.c.bf16 %v518_v53, %v517_v52  ;;  %v977_v59 = vpack.c.bf16 %v536_v55, %v535_v54 }
  0x19   : > { %v230_v23 = vpack.c.bf16 %v215_v20, %v214_v19  ;;  %v217_v29 = vld [vmem:[%s1223_s11 + $0x18] sm:$0xff]  ;;  %v218_v41 = vld [vmem:[%s1223_s11 + $0x20] sm:$0xff]  ;;  %v219_v43 = vld [vmem:[%s1223_s11 + $0x28] sm:$0xff] }
  0x1a   : > { %991 = vmatpush3.bf16.msra.mxu1 %v959_v26  ;;  %v231_v34 = vpack.c.bf16 %v217_v29, %v216_v28  ;;  %v232_v49 = vpack.c.bf16 %v219_v43, %v218_v41  ;;  %v220_v57 = vld [vmem:[%s1223_s11 + $0x30] sm:$0xff]  ;;  %v221_v58 = vld [vmem:[%s1223_s11 + $0x38] sm:$0xff]  ;;  %v222_v61 = vld [vmem:[%s1223_s11 + $0x40] sm:$0xff] }
  0x1b   : > { %821 = vmatmul.mubr.msk.bf16.vlgmr.msra.gmra.mrb[0].mxu0 %vm248_vm1, %v230_v23  ;;  %984 = vmatprep.subr.bf16.mxu1 %v961_v30  ;;  %v233_v60 = vpack.c.bf16 %v221_v58, %v220_v57  ;;  %v223_v62 = vld [vmem:[%s1223_s11 + $0x48] sm:$0xff]  ;;  %v224_v0 = vld [vmem:[%s1223_s11 + $0x50] sm:$0xff]  ;;  %v225_v1 = vld [vmem:[%s1223_s11 + $0x58] sm:$0xff] }
  0x1c   : > { %322 = vmatprep.mubr.bf16.mxu0 %v1103_v3  ;;  %952 = vmatpush3.bf16.msra.mxu0 %v951_v11  ;;  %v234_v63 = vpack.c.bf16 %v223_v62, %v222_v61  ;;  %v235_v2 = vpack.c.bf16 %v225_v1, %v224_v0  ;;  %v226_v4 = vld [vmem:[%s1223_s11 + $0x60] sm:$0xff]  ;;  %v227_v5 = vld [vmem:[%s1223_s11 + $0x68] sm:$0xff]  ;;  %v228_v7 = vld [vmem:[%s1223_s11 + $0x70] sm:$0xff] }
  0x1d   : > { %954 = vmatprep.subr.bf16.mxu0 %v953_v12  ;;  %v236_v6 = vpack.c.bf16 %v227_v5, %v226_v4  ;;  %v229_v8 = vld [vmem:[%s1223_s11 + $0x78] sm:$0xff]  ;;  %v519_v10 = vld [vmem:[%s1436_s2 + $0x70] sm:$0xff]  ;;  %s1325_s11 = scalar_lea.vmem [#allocation2], %s814_s20 }
  0x1e   : > { %992 = vmatpush3.bf16.msra.mxu1 %v963_v35  ;;  %v237_v9 = vpack.c.bf16 %v229_v8, %v228_v7  ;;  %v520_v11 = vld [vmem:[%s1436_s2 + $0x78] sm:$0xff]  ;;  %s719_s23 = sshll.u32 %s1325_s11, 4  ;;  %s1350_s23 = int_to_ptr.vmem [resolvable:$true] %s719_s23 }
  0x1f   : > { %985 = vmatprep.subr.bf16.mxu1 %v965_v36  ;;  %v979_v12 = vpack.c.bf16 %v520_v11, %v519_v10  ;;  %s1039_s6 = scalar_lea.vmem %s1350_s23, 2048  ;;  %p1046_p0 = scmp.lt.s32.totalorder %s1350_s23, %s1044_s7 }
  0x20   : > { %956 = vmatpush3.bf16.msra.mxu0 %v955_v17  ;;  %p1040_p11 = scmp.ne.s32.totalorder %s1350_s23, %s1039_s6  ;;  %p1047_p1 = scmp.lt.s32.totalorder %s1045_s9, %s1039_s6 }
  0x21   : > { %958 = vmatprep.subr.bf16.mxu0 %v957_v21 }
  0x22   : > { %993 = vmatpush3.bf16.msra.mxu1 %v967_v42  ;;  %p1041_p12 = pnand %p1040_p11, %p1170_p5  ;;  %p1048_p2 = por %p1047_p1, %p1046_p0 }
  0x23   : > { %822 = vmatmul.mubr.msk.bf16.gmra.mrb[4].mxu0 %vm248_vm1, %v231_v34  ;;  %986 = vmatprep.subr.bf16.mxu1 %v969_v44 }
  0x24   : > { %332 = vmatprep.mubr.bf16.mxu0 %v1103_v3  ;;  %960 = vmatpush3.bf16.msra.mxu0 %v959_v26  ;;  %p1042_p13 = pneg %p1041_p12 }
  0x25   : > { %962 = vmatprep.subr.bf16.mxu0 %v961_v30 }
  0x26   : > { %994 = vmatpush3.bf16.msra.mxu1 %v971_v50  ;;  %p1049_p3 = pnand %p1048_p2, %p1042_p13 }
  0x27   : > { %987 = vmatprep.subr.bf16.mxu1 %v973_v51 }
  0x28   : > { %964 = vmatpush3.bf16.msra.mxu0 %v963_v35 }
  0x29   : > { %966 = vmatprep.subr.bf16.mxu0 %v965_v36 }
  0x2a   : > { %995 = vmatpush3.bf16.msra.mxu1 %v975_v56 }
  0x2b   : > { %823 = vmatmul.mubr.msk.bf16.gmra.mrb[8].mxu0 %vm248_vm1, %v232_v49  ;;  %988 = vmatprep.subr.bf16.mxu1 %v977_v59 }
  0x2c   : > { %342 = vmatprep.mubr.bf16.mxu0 %v1103_v3  ;;  %968 = vmatpush3.bf16.msra.mxu0 %v967_v42 }
  0x2d   : > { %970 = vmatprep.subr.bf16.mxu0 %v969_v44 }
  0x2e   : > { %996 = vmatpush3.bf16.msra.mxu1 %v979_v12 }
  0x30   : > { %972 = vmatpush3.bf16.msra.mxu0 %v971_v50 }
  0x31   : > { %974 = vmatprep.subr.bf16.mxu0 %v973_v51 }
  0x33   : > { %824 = vmatmul.mubr.msk.bf16.gmra.mrb[12].mxu0 %vm248_vm1, %v233_v60 }
  0x34   : > { %352 = vmatprep.mubr.bf16.mxu0 %v1103_v3  ;;  %976 = vmatpush3.bf16.msra.mxu0 %v975_v56 }
  0x35   : > { %978 = vmatprep.subr.bf16.mxu0 %v977_v59 }
  0x38   : > { %980 = vmatpush3.bf16.msra.mxu0 %v979_v12 }
  0x3b   : > { %825 = vmatmul.mubr.msk.bf16.gmra.mrb[16].mxu0 %vm248_vm1, %v234_v63 }
  0x3c   : > { %362 = vmatprep.mubr.bf16.mxu0 %v1103_v3 }
  0x43   : > { %826 = vmatmul.mubr.msk.bf16.gmra.mrb[20].mxu0 %vm248_vm1, %v235_v2 }
  0x44   : > { %372 = vmatprep.mubr.bf16.mxu0 %v1103_v3 }
  0x4b   : > { %827 = vmatmul.mubr.msk.bf16.gmra.mrb[24].mxu0 %vm248_vm1, %v236_v6 }
  0x4c   : > { %382 = vmatprep.mubr.bf16.mxu0 %v1103_v3 }
  0x53   : > { %828 = vmatmul.mubr.msk.bf16.gmra.mrb[28].mxu0 %vm248_vm1, %v237_v9 }
  0xee   : > { %v314_v3 = vpop.f32.mrb[0].mxu0 }
  0xef   : > { %v316_v13 = vpop.f32.mrb[1].mxu0 }
  0xf0   : > { %v851_v14 = vpack.c.bf16 %v316_v13, %v314_v3  ;;  %v318_v15 = vpop.f32.mrb[2].mxu0  ;;  %601 = vmatprep.mubr.f32.mxu0 %v316_v13 }
  0xf1   : > { %v320_v16 = vpop.f32.mrb[3].mxu0  ;;  %602 = vmatmul.mubr.f32.vlgmr.msra.gmra.mrb[32].mxu0 %v314_v3 }
  0xf2   : > { %489 = vst [vmem:[%s1325_s11] sm:$0xff] %v851_v14  ;;  %v852_v17 = vpack.c.bf16 %v320_v16, %v318_v15  ;;  %606 = vmatprep.mubr.f32.mxu0 %v320_v16 }
  0xf4   : > { %490 = vst [vmem:[%s1325_s11 + $0x8] sm:$0xff] %v852_v17 }
  0xf5   : > { %607 = vmatmul.mubr.f32.gmra.mrb[34].mxu0 %v318_v15 }
  0xf6   : > { %v324_v18 = vpop.f32.mrb[4].mxu0 }
  0xf7   : > { %v326_v19 = vpop.f32.mrb[5].mxu0 }
  0xf8   : > { %v853_v20 = vpack.c.bf16 %v326_v19, %v324_v18  ;;  %v328_v21 = vpop.f32.mrb[6].mxu0  ;;  %611 = vmatprep.mubr.f32.mxu0 %v326_v19 }
  0xf9   : > { %v330_v22 = vpop.f32.mrb[7].mxu0  ;;  %612 = vmatmul.mubr.f32.gmra.mrb[36].mxu0 %v324_v18 }
  0xfa   : > { %491 = vst [vmem:[%s1325_s11 + $0x10] sm:$0xff] %v853_v20  ;;  %v854_v23 = vpack.c.bf16 %v330_v22, %v328_v21  ;;  %616 = vmatprep.mubr.f32.mxu1 %v330_v22 }
  0xfb   : > { %617 = vmatmul.mubr.f32.vlgmr.msra.gmra.mrb[0].mxu1 %v328_v21 }
  0xfc   : > { %492 = vst [vmem:[%s1325_s11 + $0x18] sm:$0xff] %v854_v23 }
  0xfe   : > { %v334_v24 = vpop.f32.mrb[8].mxu0 }
  0xff   : > { %v336_v25 = vpop.f32.mrb[9].mxu0 }
 0x100   : > { %v855_v26 = vpack.c.bf16 %v336_v25, %v334_v24  ;;  %v338_v27 = vpop.f32.mrb[10].mxu0  ;;  %621 = vmatprep.mubr.f32.mxu1 %v336_v25 }
 0x101   : > { %v340_v28 = vpop.f32.mrb[11].mxu0  ;;  %622 = vmatmul.mubr.f32.gmra.mrb[2].mxu1 %v334_v24 }
 0x102   : > { %493 = vst [vmem:[%s1325_s11 + $0x20] sm:$0xff] %v855_v26  ;;  %v856_v29 = vpack.c.bf16 %v340_v28, %v338_v27  ;;  %626 = vmatprep.mubr.f32.mxu1 %v340_v28 }
 0x104   : > { %494 = vst [vmem:[%s1325_s11 + $0x28] sm:$0xff] %v856_v29 }
 0x105   : > { %627 = vmatmul.mubr.f32.gmra.mrb[4].mxu1 %v338_v27 }
 0x106   : > { %v344_v30 = vpop.f32.mrb[12].mxu0 }
 0x107   : > { %v346_v31 = vpop.f32.mrb[13].mxu0 }
 0x108   : > { %v857_v32 = vpack.c.bf16 %v346_v31, %v344_v30  ;;  %v348_v33 = vpop.f32.mrb[14].mxu0  ;;  %631 = vmatprep.mubr.f32.mxu1 %v346_v31 }
 0x109   : > { %v350_v34 = vpop.f32.mrb[15].mxu0  ;;  %632 = vmatmul.mubr.f32.gmra.mrb[6].mxu1 %v344_v30 }
 0x10a   : > { %495 = vst [vmem:[%s1325_s11 + $0x30] sm:$0xff] %v857_v32  ;;  %v858_v35 = vpack.c.bf16 %v350_v34, %v348_v33  ;;  %636 = vmatprep.mubr.f32.mxu1 %v350_v34 }
 0x10c   : > { %496 = vst [vmem:[%s1325_s11 + $0x38] sm:$0xff] %v858_v35 }
 0x10d   : > { %637 = vmatmul.mubr.f32.gmra.mrb[8].mxu1 %v348_v33 }
 0x10e   : > { %v354_v36 = vpop.f32.mrb[16].mxu0 }
 0x10f   : > { %v356_v37 = vpop.f32.mrb[17].mxu0 }
 0x110   : > { %v859_v38 = vpack.c.bf16 %v356_v37, %v354_v36  ;;  %v358_v39 = vpop.f32.mrb[18].mxu0  ;;  %641 = vmatprep.mubr.f32.mxu1 %v356_v37 }
 0x111   : > { %v360_v40 = vpop.f32.mrb[19].mxu0  ;;  %642 = vmatmul.mubr.f32.gmra.mrb[10].mxu1 %v354_v36 }
 0x112   : > { %497 = vst [vmem:[%s1325_s11 + $0x40] sm:$0xff] %v859_v38  ;;  %v860_v41 = vpack.c.bf16 %v360_v40, %v358_v39  ;;  %646 = vmatprep.mubr.f32.mxu1 %v360_v40 }
 0x114   : > { %498 = vst [vmem:[%s1325_s11 + $0x48] sm:$0xff] %v860_v41 }
 0x115   : > { %647 = vmatmul.mubr.f32.gmra.mrb[12].mxu1 %v358_v39 }
 0x116   : > { %v364_v42 = vpop.f32.mrb[20].mxu0 }
 0x117   : > { %v366_v43 = vpop.f32.mrb[21].mxu0 }
 0x118   : > { %v861_v44 = vpack.c.bf16 %v366_v43, %v364_v42  ;;  %v368_v45 = vpop.f32.mrb[22].mxu0  ;;  %651 = vmatprep.mubr.f32.mxu1 %v366_v43 }
 0x119   : > { %v370_v46 = vpop.f32.mrb[23].mxu0  ;;  %652 = vmatmul.mubr.f32.gmra.mrb[14].mxu1 %v364_v42 }
 0x11a   : > { %499 = vst [vmem:[%s1325_s11 + $0x50] sm:$0xff] %v861_v44  ;;  %v862_v47 = vpack.c.bf16 %v370_v46, %v368_v45  ;;  %656 = vmatprep.mubr.f32.mxu1 %v370_v46 }
 0x11c   : > { %500 = vst [vmem:[%s1325_s11 + $0x58] sm:$0xff] %v862_v47 }
 0x11d   : > { %657 = vmatmul.mubr.f32.gmra.mrb[16].mxu1 %v368_v45 }
 0x11e   : > { %v374_v48 = vpop.f32.mrb[24].mxu0 }
 0x11f   : > { %v376_v49 = vpop.f32.mrb[25].mxu0 }
 0x120   : > { %v863_v50 = vpack.c.bf16 %v376_v49, %v374_v48  ;;  %v378_v51 = vpop.f32.mrb[26].mxu0  ;;  %661 = vmatprep.mubr.f32.mxu1 %v376_v49 }
 0x121   : > { %v380_v52 = vpop.f32.mrb[27].mxu0  ;;  %662 = vmatmul.mubr.f32.gmra.mrb[18].mxu1 %v374_v48 }
 0x122   : > { %501 = vst [vmem:[%s1325_s11 + $0x60] sm:$0xff] %v863_v50  ;;  %v864_v53 = vpack.c.bf16 %v380_v52, %v378_v51  ;;  %666 = vmatprep.mubr.f32.mxu1 %v380_v52 }
 0x124   : > { %502 = vst [vmem:[%s1325_s11 + $0x68] sm:$0xff] %v864_v53 }
 0x125   : > { %667 = vmatmul.mubr.f32.gmra.mrb[20].mxu1 %v378_v51 }
 0x126   : > { %v384_v54 = vpop.f32.mrb[28].mxu0 }
 0x127   : > { %v386_v55 = vpop.f32.mrb[29].mxu0 }
 0x128   : > { %v865_v56 = vpack.c.bf16 %v386_v55, %v384_v54  ;;  %v388_v57 = vpop.f32.mrb[30].mxu0  ;;  %671 = vmatprep.mubr.f32.mxu1 %v386_v55 }
 0x129   : > { %v390_v58 = vpop.f32.mrb[31].mxu0  ;;  %672 = vmatmul.mubr.f32.gmra.mrb[22].mxu1 %v384_v54 }
 0x12a   : > { %503 = vst [vmem:[%s1325_s11 + $0x70] sm:$0xff] %v865_v56  ;;  %v866_v59 = vpack.c.bf16 %v390_v58, %v388_v57  ;;  %676 = vmatprep.mubr.f32.mxu1 %v390_v58 }
 0x12c   : > { %504 = vst [vmem:[%s1325_s11 + $0x78] sm:$0xff] %v866_v59 }
 0x12d   : > { %677 = vmatmul.mubr.f32.gmra.mrb[24].mxu1 %v388_v57 }
 0x12e   : > { %1052 = shalt.err (!%p1049_p3)
}
 0x12f   : > { %s1053_s10 = scalar_lea.hbm %s1348_s30, 2048  ;;  %s1057_s14 = scalar_lea.hbm %s1437_s3, 4096 }
 0x130   : > { %p1054_p4 = scmp.ne.s32.totalorder %s1348_s30, %s1053_s10  ;;  %p1058_p9 = scmp.lt.u32.totalorder %s1348_s30, %s1437_s3 }
 0x131   : > { %p1059_p10 = scmp.lt.u32.totalorder %s1057_s14, %s1053_s10  ;;  %p1061_p12 = scmp.lt.u32.totalorder %s1053_s10, %s1348_s30 }
 0x132   : > { %p1055_p7 = pnand %p1054_p4, %p1170_p5 }
 0x133   : > { %p1060_p11 = por %p1059_p10, %p1058_p9 }
 0x134   : > { %p1056_p8 = pneg %p1055_p7 }
 0x135   : > { %p1062_p13 = por %p1061_p12, %p1060_p11 }
 0x137   : > { %p1063_p0 = pnand %p1062_p13, %p1056_p8 }
 0x139   : > { %1066 = shalt.err (!%p1063_p0)
}
 0x13a   : > { %s1105_s22 = smov 128   ;;  %s1106_s27 = smov 8   ;;  %vm682_vm2 = vcmask 64512  }
 0x13b   : > { %997 = dma.vmem_to_hbm [thread:$0]  (%p1170_p5), %s1350_s23, 2048, %s1348_s30, %s1354_s5, %s1105_s22, %s1105_s22, %s1106_s27  }
 0x13c   : > { %s1383_s19 = scalar_lea.vmem %s1438_s4, %s816_s8 }
 0x1c4   : > { %v901_v60 = vpop.f32.mrb[32].mxu0 }
 0x1c5   : > { %v902_v61 = vpop.f32.mrb[33].mxu0 }
 0x1c6   : > { %v903_v62 = vadd.f32 %v902_v61, %v901_v60 }
 0x1c8   : > { %683 = vst.msk [vmem:[%s1383_s19] sm:$0xff] %vm682_vm2, %v903_v62  ;;  %v904_v63 = vpop.f32.mrb[34].mxu0 }
 0x1c9   : > { %v905_v0 = vpop.f32.mrb[35].mxu0 }
 0x1ca   : > { %v906_v1 = vadd.f32 %v905_v0, %v904_v63 }
 0x1cc   : > { %684 = vst.msk [vmem:[%s1383_s19 + $0x8] sm:$0xff] %vm682_vm2, %v906_v1  ;;  %v907_v2 = vpop.f32.mrb[36].mxu0 }
 0x1cd   : > { %v908_v4 = vpop.f32.mrb[37].mxu0 }
 0x1ce   : > { %v909_v5 = vadd.f32 %v908_v4, %v907_v2  ;;  %v910_v6 = vpop.f32.mrb[0].mxu1 }
 0x1cf   : > { %v911_v7 = vpop.f32.mrb[1].mxu1 }
 0x1d0   : > { %685 = vst.msk [vmem:[%s1383_s19 + $0x10] sm:$0xff] %vm682_vm2, %v909_v5  ;;  %v912_v8 = vadd.f32 %v911_v7, %v910_v6 }
 0x1d2   : > { %686 = vst.msk [vmem:[%s1383_s19 + $0x18] sm:$0xff] %vm682_vm2, %v912_v8 }
 0x1d4   : > { %v913_v9 = vpop.f32.mrb[2].mxu1 }
 0x1d5   : > { %v914_v10 = vpop.f32.mrb[3].mxu1 }
 0x1d6   : > { %v915_v11 = vadd.f32 %v914_v10, %v913_v9 }
 0x1d8   : > { %687 = vst.msk [vmem:[%s1383_s19 + $0x20] sm:$0xff] %vm682_vm2, %v915_v11  ;;  %v916_v12 = vpop.f32.mrb[4].mxu1 }
 0x1d9   : > { %v917_v3 = vpop.f32.mrb[5].mxu1 }
 0x1da   : > { %v918_v13 = vadd.f32 %v917_v3, %v916_v12 }
 0x1dc   : > { %688 = vst.msk [vmem:[%s1383_s19 + $0x28] sm:$0xff] %vm682_vm2, %v918_v13  ;;  %v919_v14 = vpop.f32.mrb[6].mxu1 }
 0x1dd   : > { %v920_v15 = vpop.f32.mrb[7].mxu1 }
 0x1de   : > { %v921_v16 = vadd.f32 %v920_v15, %v919_v14 }
 0x1e0   : > { %689 = vst.msk [vmem:[%s1383_s19 + $0x30] sm:$0xff] %vm682_vm2, %v921_v16  ;;  %v922_v17 = vpop.f32.mrb[8].mxu1 }
 0x1e1   : > { %v923_v18 = vpop.f32.mrb[9].mxu1 }
 0x1e2   : > { %v924_v19 = vadd.f32 %v923_v18, %v922_v17 }
 0x1e4   : > { %690 = vst.msk [vmem:[%s1383_s19 + $0x38] sm:$0xff] %vm682_vm2, %v924_v19  ;;  %v925_v20 = vpop.f32.mrb[10].mxu1 }
 0x1e5   : > { %v926_v21 = vpop.f32.mrb[11].mxu1 }
 0x1e6   : > { %v927_v22 = vadd.f32 %v926_v21, %v925_v20 }
 0x1e8   : > { %691 = vst.msk [vmem:[%s1383_s19 + $0x40] sm:$0xff] %vm682_vm2, %v927_v22  ;;  %v928_v23 = vpop.f32.mrb[12].mxu1 }
 0x1e9   : > { %v929_v24 = vpop.f32.mrb[13].mxu1 }
 0x1ea   : > { %v930_v25 = vadd.f32 %v929_v24, %v928_v23 }
 0x1ec   : > { %692 = vst.msk [vmem:[%s1383_s19 + $0x48] sm:$0xff] %vm682_vm2, %v930_v25  ;;  %v931_v26 = vpop.f32.mrb[14].mxu1 }
 0x1ed   : > { %v932_v27 = vpop.f32.mrb[15].mxu1 }
 0x1ee   : > { %v933_v28 = vadd.f32 %v932_v27, %v931_v26 }
 0x1f0   : > { %693 = vst.msk [vmem:[%s1383_s19 + $0x50] sm:$0xff] %vm682_vm2, %v933_v28  ;;  %v934_v29 = vpop.f32.mrb[16].mxu1 }
 0x1f1   : > { %v935_v30 = vpop.f32.mrb[17].mxu1 }
 0x1f2   : > { %v936_v31 = vadd.f32 %v935_v30, %v934_v29 }
 0x1f4   : > { %694 = vst.msk [vmem:[%s1383_s19 + $0x58] sm:$0xff] %vm682_vm2, %v936_v31  ;;  %v937_v32 = vpop.f32.mrb[18].mxu1 }
 0x1f5   : > { %v938_v33 = vpop.f32.mrb[19].mxu1 }
 0x1f6   : > { %v939_v34 = vadd.f32 %v938_v33, %v937_v32 }
 0x1f8   : > { %695 = vst.msk [vmem:[%s1383_s19 + $0x60] sm:$0xff] %vm682_vm2, %v939_v34  ;;  %v940_v35 = vpop.f32.mrb[20].mxu1 }
 0x1f9   : > { %v941_v36 = vpop.f32.mrb[21].mxu1 }
 0x1fa   : > { %v942_v37 = vadd.f32 %v941_v36, %v940_v35 }
 0x1fc   : > { %696 = vst.msk [vmem:[%s1383_s19 + $0x68] sm:$0xff] %vm682_vm2, %v942_v37  ;;  %v943_v38 = vpop.f32.mrb[22].mxu1 }
 0x1fd   : > { %v944_v39 = vpop.f32.mrb[23].mxu1 }
 0x1fe   : > { %v945_v40 = vadd.f32 %v944_v39, %v943_v38 }
 0x200   : > { %697 = vst.msk [vmem:[%s1383_s19 + $0x70] sm:$0xff] %vm682_vm2, %v945_v40  ;;  %v946_v41 = vpop.f32.mrb[24].mxu1 }
 0x201   : > { %v947_v42 = vpop.f32.mrb[25].mxu1 }
 0x202   : > { %v948_v43 = vadd.f32 %v947_v42, %v946_v41 }
 0x204   : > { %698 = vst.msk [vmem:[%s1383_s19 + $0x78] sm:$0xff] %vm682_vm2, %v948_v43 }
 0x205 PF: > { %p1003_p5 = scmp.ge.s32.totalorder %s1101_s18, 2  ;;  %s738_s25 = sand.u32 1, %s1089_s15  }
 0x206   : > { %s739_s29 = scalar_lea.sflag [#allocation3], %s738_s25 }
 0x207   : > { %p1000_p1 = pnand %p1003_p5, %p1174_p6 }
 0x209   : > { %1084 = dma.done.wait (!%p1000_p1), %s739_s29, 2048  }
 0x20a   : > { %1086 = vsyncadd (!%p1000_p1), %s739_s29, 4294965248  ;;  %p15_p2 = scmp.ge.s32.totalorder %s1157_s21, 4   ;;  %s1441_s15 = smov %s1093_s16 }
 0x20b   : > { %s1442_s16 = smov %s1097_s17  ;;  %s1443_s17 = smov %s1168_s24 }
 0x20c   : > { %s1444_s18 = smov %s1157_s21  ;;  %17 = sbr.rel (!%p15_p2) target bundleno = 3 (0x3), region = 79 }
 0x213   :  { %752 = vsyncpa [#allocation3], 1 }
 0x214   :  { %754 = vsyncpa [#allocation3 + $0x1], 1 }

</bundles_post_ra>
